<compile_context>
chip_gen: v6e
topology: v6e:2x2x1
jax: 0.10.0
libtpu: 0.0.40
codegen_flags: <defaults>
</compile_context>

<pallas_src>
import math
from functools import partial

import jax
import jax.numpy as jnp
import numpy as np
from jax.experimental import pallas as pl
from jax.experimental.pallas import tpu as pltpu

_BN_EPS = 1e-5
_LANE = 128


def _silu(x):
    return x * jax.nn.sigmoid(x)


def round_to(x, divisor=8):
    return max(divisor, int(round(x / divisor)) * divisor)


def _round_up(x, m):
    return (x + m - 1) // m * m


# -----------------------------------------------------------------------------
# pltpu.roll sign probe (run once): returns s such that
#   pltpu.roll(x, s * k, axis=0) == jnp.roll(x, k, axis=0)
# so the 3x3 tap offsets below can never be silently mirrored.
# -----------------------------------------------------------------------------
_ROLL_SIGN = None


def _get_roll_sign():
    global _ROLL_SIGN
    if _ROLL_SIGN is None:
        def kern(x_ref, o_ref):
            o_ref[...] = pltpu.roll(x_ref[...], shift=1, axis=0)

        x = jnp.arange(8 * _LANE, dtype=jnp.float32).reshape(8, _LANE)
        y = np.asarray(pl.pallas_call(
            kern, out_shape=jax.ShapeDtypeStruct((8, _LANE), jnp.float32))(x))
        xn = np.asarray(x)
        if np.array_equal(y, np.roll(xn, 1, axis=0)):
            _ROLL_SIGN = 1
        elif np.array_equal(y, np.roll(xn, -1, axis=0)):
            _ROLL_SIGN = -1
        else:
            raise RuntimeError("unexpected pltpu.roll semantics")
    return _ROLL_SIGN


def _tap_shifts(wp, p_pad):
    """Rotation amount per 3x3 tap (row-major dy, dx) in the flat padded layout.

    Tap (dy, dx) of the conv at flat output position j reads the activation at
    j + (dy-1)*wp + (dx-1); realised as a whole-buffer rotation (no wrap hits
    the real pixels because of the halo)."""
    sign = _get_roll_sign()
    shifts = []
    for dy in range(3):
        for dx in range(3):
            delta = (dy - 1) * wp + (dx - 1)
            shifts.append(0 if delta == 0 else (sign * (-delta)) % p_pad)
    return tuple(shifts)


def _core_mask(h, w, p_pad):
    """(p_pad, 1) f32 mask: 1.0 at real pixels, 0.0 at halo / tail rows."""
    hp, wp = h + 2, w + 2
    m = np.zeros((hp, wp), np.float32)
    m[1:1 + h, 1:1 + w] = 1.0
    m = np.pad(m.reshape(-1), (0, p_pad - hp * wp))
    return jnp.asarray(m.reshape(p_pad, 1))


# -----------------------------------------------------------------------------
# Fused DecoupledHeadUnit kernel (one grid step per image).
# -----------------------------------------------------------------------------
def _head_unit_kernel(mask_ref, x_ref, stem_w_ref, stem_b_ref,
                      conv_w_ref, conv_b_ref, out_w_ref, out_b_ref,
                      o_ref, act_a, act_b, *, shifts):
    f32, bf16 = jnp.float32, jnp.bfloat16
    mask = mask_ref[...]                                     # (P, 1) f32

    # ---- stem: 1x1 conv (+folded BN) + SiLU over the whole padded grid;
    #      halo / tail rows are re-zeroed so the 3x3 taps see zero padding.
    h = jnp.dot(x_ref[0], stem_w_ref[...], preferred_element_type=f32)
    act_a[...] = _silu(h + stem_b_ref[...]) * mask

    def conv3x3(src_ref, li):
        """3x3 ConvBnAct (+SiLU) over the flat padded activation in `src_ref`.

        Each tap = static whole-buffer sublane rotation (XLU) + bf16 MXU dot;
        halo rows of the result are garbage and are masked / discarded."""
        src = src_ref[...]
        acc = jnp.zeros((src.shape[0], conv_w_ref.shape[-1]), f32)
        for t, s in enumerate(shifts):
            tap = src if s == 0 else pltpu.roll(src, shift=s, axis=0)
            acc = acc + jnp.dot(tap.astype(bf16), conv_w_ref[li, t],
                                preferred_element_type=f32)
        return _silu(acc + conv_b_ref[li])

    # ---- reg tower; fused reg/obj 1x1 head runs on the f32 activation that is
    #      still resident in VMEM (no HBM round trip of h1).
    act_b[...] = conv3x3(act_a, 0) * mask
    h1 = conv3x3(act_b, 1)
    out = jnp.dot(h1.astype(bf16), out_w_ref[0], preferred_element_type=f32)

    # ---- cls tower, accumulated into the same (disjoint-column) output slab.
    act_b[...] = conv3x3(act_a, 2) * mask
    h2 = conv3x3(act_b, 3)
    out = out + jnp.dot(h2.astype(bf16), out_w_ref[1], preferred_element_type=f32)

    # Single lane-dense (P, 128) store.
    o_ref[0] = (out + out_b_ref[...]).astype(o_ref.dtype)


def _head_unit_call(n, p_pad, cin, hidden, out_pad, shifts):
    return pl.pallas_call(
        partial(_head_unit_kernel, shifts=shifts),
        out_shape=jax.ShapeDtypeStruct((n, p_pad, out_pad), jnp.float32),
        grid_spec=pltpu.PrefetchScalarGridSpec(
            num_scalar_prefetch=0,
            grid=(n,),
            in_specs=[
                pl.BlockSpec((p_pad, 1), lambda i: (0, 0)),                    # mask
                pl.BlockSpec((1, p_pad, cin), lambda i: (i, 0, 0)),            # x
                pl.BlockSpec((cin, hidden), lambda i: (0, 0)),                 # stem w
                pl.BlockSpec((1, hidden), lambda i: (0, 0)),                   # stem b
                pl.BlockSpec((4, 9, hidden, hidden), lambda i: (0, 0, 0, 0)),  # 3x3 w
                pl.BlockSpec((4, 1, hidden), lambda i: (0, 0, 0)),             # 3x3 b
                pl.BlockSpec((2, hidden, out_pad), lambda i: (0, 0, 0)),       # out w
                pl.BlockSpec((1, out_pad), lambda i: (0, 0)),                  # out b
            ],
            out_specs=pl.BlockSpec((1, p_pad, out_pad), lambda i: (i, 0, 0)),
            scratch_shapes=[
                pltpu.VMEM((p_pad, hidden), jnp.float32),   # hstem (shared by towers)
                pltpu.VMEM((p_pad, hidden), jnp.float32),   # reg1 / cls1 output
            ],
        ),
        compiler_params=pltpu.CompilerParams(
            dimension_semantics=("parallel",),
            vmem_limit_bytes=64 * 1024 * 1024,
        ),
    )


def head_unit_forward(params, x_nchw, *, num_classes):
    n, cin, h, w = x_nchw.shape
    hp, wp = h + 2, w + 2
    p = hp * wp
    p_pad = _round_up(p, 8)
    hidden = params["stem_w"].shape[1]
    out_pad = params["out_w"].shape[-1]
    c_used = 4 + 1 + num_classes

    # NCHW -> NHWC, zero halo, flatten spatial, pad rows to a sublane multiple,
    # cast to bf16 -- the only host-side layout pass per head.
    x = jnp.transpose(x_nchw, (0, 2, 3, 1))
    x = jnp.pad(x, ((0, 0), (1, 1), (1, 1), (0, 0))).reshape(n, p, cin)
    x = jnp.pad(x, ((0, 0), (0, p_pad - p), (0, 0))).astype(jnp.bfloat16)

    mask = _core_mask(h, w, p_pad)
    shifts = _tap_shifts(wp, p_pad)

    out = _head_unit_call(n, p_pad, cin, hidden, out_pad, shifts)(
        mask, x, params["stem_w"], params["stem_b"],
        params["conv_w"], params["conv_b"], params["out_w"], params["out_b"])

    y = out[:, :p, :].reshape(n, hp, wp, out_pad)[:, 1:1 + h, 1:1 + w, :c_used]
    return jnp.transpose(y, (0, 3, 1, 2))                  # NCHW (n, 5+nc, h, w)


def yolox_head_forward(params_list, inputs, *, num_classes):
    return [head_unit_forward(p, x, num_classes=num_classes)
            for p, x in zip(params_list, inputs)]


# -----------------------------------------------------------------------------
# Parameter construction (synthetic weights, eval-mode BN folded, bf16 weights).
# -----------------------------------------------------------------------------
def _fold_bn(w, gamma, beta, mean, var):
    scale = gamma / jnp.sqrt(var + _BN_EPS)
    return w * scale, beta - mean * scale


def _init_convbnact(key, kh, kw, cin, cout):
    k = jax.random.split(key, 5)
    fan_in = cin * kh * kw
    w = jax.random.normal(k[0], (kh, kw, cin, cout), jnp.float32) / math.sqrt(fan_in)
    gamma = 1.0 + 0.1 * jax.random.normal(k[1], (cout,), jnp.float32)
    beta = 0.1 * jax.random.normal(k[2], (cout,), jnp.float32)
    mean = 0.1 * jax.random.normal(k[3], (cout,), jnp.float32)
    var = (1.0 + 0.1 * jax.random.normal(k[4], (cout,), jnp.float32)) ** 2
    w_eff, b_eff = _fold_bn(w, gamma, beta, mean, var)
    return w_eff, b_eff.reshape(1, cout)


def _init_conv1x1_out(key, cin, cout, bias_const=None):
    k = jax.random.split(key, 2)
    bound = 1.0 / math.sqrt(cin)
    w = jax.random.uniform(k[0], (cin, cout), jnp.float32, -bound, bound)
    if bias_const is None:
        b = jax.random.uniform(k[1], (1, cout), jnp.float32, -bound, bound)
    else:
        b = jnp.full((1, cout), bias_const, jnp.float32)
    return w, b


def init_head_unit_params(key, cin, hidden, num_classes, prior_prob=0.01):
    ks = jax.random.split(key, 8)
    bias_prior = -math.log((1.0 - prior_prob) / prior_prob)
    c_used = 4 + 1 + num_classes
    out_pad = _round_up(max(c_used, _LANE), _LANE)

    stem_w, stem_b = _init_convbnact(ks[0], 1, 1, cin, hidden)
    stem_w = stem_w.reshape(cin, hidden)

    # conv order: reg1, reg2, cls1, cls2 ; taps stored row-major (dy, dx).
    convs = [_init_convbnact(k, 3, 3, hidden, hidden) for k in ks[1:5]]
    conv_w = jnp.stack([w.reshape(9, hidden, hidden) for w, _ in convs])
    conv_b = jnp.stack([b for _, b in convs])

    reg_w, reg_b = _init_conv1x1_out(ks[5], hidden, 4)
    obj_w, obj_b = _init_conv1x1_out(ks[6], hidden, 1, bias_const=bias_prior)
    cls_w, cls_b = _init_conv1x1_out(ks[7], hidden, num_classes, bias_const=bias_prior)

    # One lane-dense output slab: cols [0:4]=reg, [4]=obj, [5:5+nc]=cls, rest 0.
    out_w = jnp.zeros((2, hidden, out_pad), jnp.float32)
    out_w = out_w.at[0, :, 0:4].set(reg_w).at[0, :, 4:5].set(obj_w)
    out_w = out_w.at[1, :, 5:5 + num_classes].set(cls_w)
    out_b = jnp.zeros((1, out_pad), jnp.float32)
    out_b = out_b.at[:, 0:4].set(reg_b).at[:, 4:5].set(obj_b)
    out_b = out_b.at[:, 5:5 + num_classes].set(cls_b)

    return dict(
        stem_w=stem_w.astype(jnp.bfloat16), stem_b=stem_b,
        conv_w=conv_w.astype(jnp.bfloat16), conv_b=conv_b,
        out_w=out_w.astype(jnp.bfloat16), out_b=out_b,
    )


# -----------------------------------------------------------------------------
# Pure-JAX reference with the same bf16-operand / f32-accumulate math.
# -----------------------------------------------------------------------------
def head_unit_reference(params, x_nchw, *, num_classes):
    f32, bf16 = jnp.float32, jnp.bfloat16
    n, cin, h, w = x_nchw.shape
    x = jnp.transpose(x_nchw, (0, 2, 3, 1)).astype(bf16)

    def conv1x1(xb, wgt, b):
        y = jnp.einsum("nhwc,cd->nhwd", xb, wgt, preferred_element_type=f32)
        return y + b.reshape(1, 1, 1, -1)

    def conv3x3(xb, w9, b):
        xp = jnp.pad(xb, ((0, 0), (1, 1), (1, 1), (0, 0)))
        acc = jnp.zeros(xb.shape[:3] + (w9.shape[-1],), f32)
        t = 0
        for dy in range(3):
            for dx in range(3):
                acc = acc + jnp.einsum("nhwc,cd->nhwd",
                                       xp[:, dy:dy + h, dx:dx + w, :], w9[t],
                                       preferred_element_type=f32)
                t += 1
        return _silu(acc + b.reshape(1, 1, 1, -1))

    hstem = _silu(conv1x1(x, params["stem_w"], params["stem_b"])).astype(bf16)
    cw, cb = params["conv_w"], params["conv_b"]
    h1 = conv3x3(conv3x3(hstem, cw[0], cb[0]).astype(bf16), cw[1], cb[1]).astype(bf16)
    h2 = conv3x3(conv3x3(hstem, cw[2], cb[2]).astype(bf16), cw[3], cb[3]).astype(bf16)
    ow, ob = params["out_w"], params["out_b"]
    nc = num_classes
    y = jnp.concatenate(
        [conv1x1(h1, ow[0, :, :5], ob[:, :5]),
         conv1x1(h2, ow[1, :, 5:5 + nc], ob[:, 5:5 + nc])], axis=-1)
    return jnp.transpose(y, (0, 3, 1, 2))


if __name__ == "__main__":
    in_channels = [8, 16]
    num_classes = 3
    width_mult = 0.0625                     # hidden = round_to(256 * 0.0625) = 16
    hidden = round_to(256 * width_mult)
    spatial = [16, 12]                      # 12 shows non-multiple-of-128 row counts work
    batch = 2

    key = jax.random.PRNGKey(0)
    k_params, k_x = jax.random.split(key)
    head_keys = jax.random.split(k_params, len(in_channels))
    params_list = [init_head_unit_params(hk, c, hidden, num_classes)
                   for hk, c in zip(head_keys, in_channels)]

    x_keys = jax.random.split(k_x, len(in_channels))
    inputs = [jax.random.normal(xk, (batch, c, s, s), jnp.float32)
              for xk, c, s in zip(x_keys, in_channels, spatial)]

    outs = jax.block_until_ready(
        yolox_head_forward(params_list, inputs, num_classes=num_classes))

    refs = jax.block_until_ready(
        [head_unit_reference(p, x, num_classes=num_classes)
         for p, x in zip(params_list, inputs)])

    for o, r, s in zip(outs, refs, spatial):
        assert o.shape == (batch, 4 + 1 + num_classes, s, s), o.shape
        assert o.dtype == jnp.float32
        np.testing.assert_allclose(np.asarray(o), np.asarray(r),
                                   rtol=2e-2, atol=2e-2)
    print("KERNEL_OK")
</pallas_src>

<mosaic_0001>
module attributes {stable_mosaic.version = 11 : i64} {
  func.func @kern(%arg0: memref<8x128xf32, #tpu.memory_space<vmem>>, %arg1: memref<8x128xf32, #tpu.memory_space<vmem>>) attributes {dimension_semantics = [], scalar_prefetch = 0 : i64, scratch_operands = 0 : i64, tpu.core_type = #tpu.core_type<tc>} {
    %c0 = arith.constant 0 : index
    %c0_0 = arith.constant 0 : index
    %0 = vector.load %arg0[%c0, %c0_0] : memref<8x128xf32, #tpu.memory_space<vmem>>, vector<8x128xf32>
    %c1_i32 = arith.constant 1 : i32
    %1 = tpu.dynamic_rotate %0 by %c1_i32 dim 0 : vector<8x128xf32>, i32 -> vector<8x128xf32>
    %c0_1 = arith.constant 0 : index
    %c0_2 = arith.constant 0 : index
    %2 = vector.load %arg1[%c0_1, %c0_2] : memref<8x128xf32, #tpu.memory_space<vmem>>, vector<8x128xf32>
    tpu.vector_store %arg1[%c0_1, %c0_2], %1 {strides = array<i32>} : memref<8x128xf32, #tpu.memory_space<vmem>>, vector<8x128xf32>,
    return
  }
}

</mosaic_0001>

<bundles_post_ra>
// kernel: tpu_custom_call.1
= control target key start
LH: loop header
LB: loop body
LE: loop exit
PB: predicated region body
PF: predicated region fallthrough
CT: control target
= control target key end

     0   :  { %6 = vsyncpa [#allocation3], 0  ;;  %s103_s0 = inlined_call_operand.hbm [shape: f32[8,128], index: 0, kind: input, shape index: {}]   ;;  %s104_s1 = inlined_call_operand.hbm [shape: f32[8,128], index: 1, kind: output, shape index: {}]  }
   0x1   :  { %7 = vsyncpa [#allocation4], 0  ;;  %s85_s6 = smov [#allocation2]  }
   0x2   :  { %s14_s7 = sshll.u32 %s85_s6, 4  ;;  %s15_s7 = int_to_ptr.vmem [resolvable:$true] %s14_s7 }
   0x3   :  { %s49_s8 = scalar_lea.vmem %s15_s7, 128  ;;  %p54_p1 = scmp.lt.s32.totalorder %s15_s7, %s15_s7 }
   0x4   :  { %p50_p0 = scmp.ne.s32.totalorder %s15_s7, %s49_s8  ;;  %p55_p2 = scmp.lt.s32.totalorder %s49_s8, %s49_s8 }
   0x6   :  { %p56_p3 = por %p55_p2, %p54_p1 }
   0x8   :  { %p57_p4 = pnand %p56_p3, %p50_p0 }
   0xa   :  { %60 = shalt.err (!%p57_p4)
}
   0xb   :  { %17 = dma.hbm_to_vmem [thread:$0]  %s103_s0, 128, %s15_s7, [#allocation3]  }
   0xc   :  { %81 = dma.done.wait [#allocation3], 128  }
   0xd   :  { %82 = vsyncadd [#allocation3], 4294967168  ;;  %s86_s11 = smov [#allocation5]   ;;  %v21_v0 = vld [vmem:[#allocation2] sm:$0xff] }
   0xe   :  { %s30_s12 = sshll.u32 %s86_s11, 4  ;;  %v22_v1 = vrot.slane %v21_v0, 7  ;;  %s31_s12 = int_to_ptr.vmem [resolvable:$true] %s30_s12 }
   0xf   :  { %s61_s13 = scalar_lea.vmem %s31_s12, 128  ;;  %p66_p6 = scmp.lt.s32.totalorder %s31_s12, %s31_s12 }
  0x10   :  { %23 = vst [vmem:[#allocation5] sm:$0xff] %v22_v1  ;;  %p62_p5 = scmp.ne.s32.totalorder %s31_s12, %s61_s13  ;;  %p67_p7 = scmp.lt.s32.totalorder %s61_s13, %s61_s13 }
  0x12   :  { %p68_p8 = por %p67_p7, %p66_p6 }
  0x14   :  { %p69_p9 = pnand %p68_p8, %p62_p5 }
  0x16   :  { %72 = shalt.err (!%p69_p9)
}
  0x17   :  { %33 = dma.vmem_to_hbm [thread:$0]  %s31_s12, 128, %s104_s1, [#allocation4]  }
  0x18   :  { %83 = dma.done.wait [#allocation4], 128  }
  0x19   :  { %84 = vsyncadd [#allocation4], 4294967168 }
  0x1a   :  { %37 = vsyncpa [#allocation3], 1 }
  0x1b   :  { %38 = vsyncpa [#allocation4], 1 }

</bundles_post_ra>
